<compile_context>
chip_gen: v5e
topology: v5e:2x2
jax: 0.10.0
libtpu: 0.0.40
codegen_flags: <defaults>
</compile_context>

<pallas_src>
import functools

import jax
import jax.numpy as jnp
from jax.experimental import pallas as pl
from jax.experimental.pallas import tpu as pltpu


def _rmsnorm_kernel(x_ref, w_ref, o_ref, *, eps):
    # x_ref: (rows_tile, D)  w_ref: (1, D)  o_ref: (rows_tile, D)
    x = x_ref[...].astype(jnp.float32)
    w = w_ref[...].astype(jnp.float32)               # (1, D), broadcasts over rows
    ms = jnp.mean(x * x, axis=-1, keepdims=True)     # (rows_tile, 1)  -- XLU reduce
    inv = jax.lax.rsqrt(ms + eps)                    # EUP slot, effectively free
    o_ref[...] = (x * inv * w).astype(o_ref.dtype)


def _round_up(n, m):
    return ((n + m - 1) // m) * m


def _select_rows_tile(rows, d, itemsize):
    """Largest row tile that fits comfortably in VMEM (generation-aware)."""
    # Sublane packing: 8 rows/vreg for 4-byte dtypes, 16 for 2-byte, 32 for 1-byte.
    sublane = max(8, 32 // itemsize)
    try:
        vmem_cap = pltpu.get_tpu_info().vmem_capacity_bytes  # 128 MiB v5e/v6e, 64 MiB v7x
    except Exception:
        vmem_cap = 64 * 1024 * 1024  # conservative fallback (v7x-sized)
    # Double-buffered input + double-buffered output tiles => 4 live tile copies.
    budget = int(vmem_cap * 0.55)
    max_tile = budget // (4 * d * itemsize)
    max_tile = max(sublane, (max_tile // sublane) * sublane)
    # Cap so per-step overhead is amortized but the grid stays long enough to
    # keep both v7x TensorCores busy via the "parallel" axis.
    max_tile = min(max_tile, 1024)
    return min(max_tile, _round_up(rows, sublane))


def rmsnorm(x, weight, eps=1e-5, rows_tile=None):
    """RMSNorm over the last axis. x: (..., D), weight: (D,). Same shape/dtype as x."""
    orig_shape = x.shape
    d = orig_shape[-1]
    rows = 1
    for s in orig_shape[:-1]:
        rows *= s
    x2 = x.reshape(rows, d)
    w2 = weight.reshape(1, d)

    itemsize = jnp.dtype(x.dtype).itemsize
    if rows_tile is None:
        rows_tile = _select_rows_tile(rows, d, itemsize)

    # No host-side padding: cdiv grid, Pallas handles the final partial block.
    grid = (pl.cdiv(rows, rows_tile),)

    # VMEM limit: 4 double-buffered (rows_tile, d) tiles + weight + margin.
    tile_bytes = rows_tile * d * itemsize
    w_bytes = 2 * d * jnp.dtype(weight.dtype).itemsize
    vmem_limit = max(32 * 1024 * 1024, 4 * tile_bytes + w_bytes + 4 * 1024 * 1024)
    vmem_limit = int(min(vmem_limit, 120 * 1024 * 1024))

    cost = pl.CostEstimate(
        flops=3 * rows * d,
        transcendentals=rows,
        bytes_accessed=2 * rows * d * itemsize + d * jnp.dtype(weight.dtype).itemsize,
    )

    out = pl.pallas_call(
        functools.partial(_rmsnorm_kernel, eps=eps),
        out_shape=jax.ShapeDtypeStruct((rows, d), x.dtype),
        grid_spec=pltpu.PrefetchScalarGridSpec(
            num_scalar_prefetch=0,
            grid=grid,
            in_specs=[
                pl.BlockSpec((rows_tile, d), lambda i: (i, 0)),
                pl.BlockSpec((1, d), lambda i: (0, 0)),
            ],
            out_specs=pl.BlockSpec((rows_tile, d), lambda i: (i, 0)),
        ),
        compiler_params=pltpu.CompilerParams(
            dimension_semantics=("parallel",),
            vmem_limit_bytes=vmem_limit,
        ),
        cost_estimate=cost,
    )(x2, w2)

    return out.reshape(orig_shape)


if __name__ == "__main__":
    key = jax.random.PRNGKey(0)
    B, L, D = 2, 8, 32  # NOTE: production D should be a multiple of 128 for lane-dense stores
    x = jax.random.normal(key, (B, L, D), dtype=jnp.float32)
    # Parameter init matches nn.Parameter(torch.ones(d_model)); perturb slightly
    # (deterministically) so the weight multiply is actually exercised.
    weight = jnp.ones((D,), dtype=jnp.float32) + 0.01 * jnp.arange(D, dtype=jnp.float32)

    eps = 1e-5
    out = rmsnorm(x, weight, eps=eps)
    jax.block_until_ready(out)

    # Pure-JAX reference check.
    ref = x * jax.lax.rsqrt(jnp.mean(x * x, axis=-1, keepdims=True) + eps) * weight
    assert out.shape == x.shape and out.dtype == x.dtype
    assert jnp.allclose(out, ref, atol=1e-5, rtol=1e-5), "mismatch vs reference"

    print("KERNEL_OK")
</pallas_src>

<mosaic_0001>
module attributes {stable_mosaic.version = 11 : i64} {
  func.func @_rmsnorm_kernel(%arg0: i32, %arg1: memref<16x32xf32, #tpu.memory_space<vmem>>, %arg2: memref<1x32xf32, #tpu.memory_space<vmem>>, %arg3: memref<16x32xf32, #tpu.memory_space<vmem>>) attributes {dimension_semantics = [#tpu.dimension_semantics<parallel>], iteration_bounds = array<i64: 1>, scalar_prefetch = 0 : i64, scratch_operands = 0 : i64, tpu.core_type = #tpu.core_type<tc>, window_params = [{transform_indices = @transform_0, window_bounds = array<i64: 16, 32>}, {pipeline_mode = #tpu.pipeline_mode<synchronous>, transform_indices = @transform_1, window_bounds = array<i64: 1, 32>}, {transform_indices = @transform_2, window_bounds = array<i64: 16, 32>}]} {
    %c0 = arith.constant 0 : index
    %c0_0 = arith.constant 0 : index
    %0 = vector.load %arg1[%c0, %c0_0] : memref<16x32xf32, #tpu.memory_space<vmem>>, vector<16x32xf32>
    %c0_1 = arith.constant 0 : index
    %c0_2 = arith.constant 0 : index
    %1 = vector.load %arg2[%c0_1, %c0_2] : memref<1x32xf32, #tpu.memory_space<vmem>>, vector<1x32xf32>
    %2 = arith.mulf %0, %0 : vector<16x32xf32>
    %cst = arith.constant dense<0.000000e+00> : vector<16xf32>
    %3 = vector.multi_reduction <add>, %2, %cst [1] : vector<16x32xf32> to vector<16xf32>
    %4 = vector.shape_cast %3 : vector<16xf32> to vector<16x1xf32>
    %cst_3 = arith.constant 3.200000e+01 : f32
    %5 = vector.broadcast %cst_3 : f32 to vector<16x1xf32>
    %6 = arith.divf %4, %5 : vector<16x1xf32>
    %cst_4 = arith.constant 9.99999974E-6 : f32
    %7 = vector.broadcast %cst_4 : f32 to vector<16x1xf32>
    %8 = arith.addf %6, %7 : vector<16x1xf32>
    %9 = math.rsqrt %8 : vector<16x1xf32>
    %10 = vector.broadcast %9 : vector<16x1xf32> to vector<16x32xf32>
    %11 = arith.mulf %0, %10 : vector<16x32xf32>
    %12 = vector.broadcast %1 : vector<1x32xf32> to vector<16x32xf32>
    %13 = arith.mulf %11, %12 : vector<16x32xf32>
    %c0_5 = arith.constant 0 : index
    %c0_6 = arith.constant 0 : index
    %14 = vector.load %arg3[%c0_5, %c0_6] : memref<16x32xf32, #tpu.memory_space<vmem>>, vector<16x32xf32>
    tpu.vector_store %arg3[%c0_5, %c0_6], %13 {strides = array<i32>} : memref<16x32xf32, #tpu.memory_space<vmem>>, vector<16x32xf32>,
    return
  }
  func.func @transform_0(%arg0: i32) -> (i32, i32) {
    %c0_i32 = arith.constant 0 : i32
    %c0_i32_0 = arith.constant 0 : i32
    return %arg0, %c0_i32 : i32, i32
  }
  func.func @transform_1(%arg0: i32) -> (i32, i32) {
    %c0_i32 = arith.constant 0 : i32
    %c0_i32_0 = arith.constant 0 : i32
    %c0_i32_1 = arith.constant 0 : i32
    return %c0_i32, %c0_i32_0 : i32, i32
  }
  func.func @transform_2(%arg0: i32) -> (i32, i32) {
    %c0_i32 = arith.constant 0 : i32
    %c0_i32_0 = arith.constant 0 : i32
    return %arg0, %c0_i32 : i32, i32
  }
}

</mosaic_0001>

<bundles_post_ra>
// kernel: tpu_custom_call.1
= control target key start
LH: loop header
LB: loop body
LE: loop exit
PB: predicated region body
PF: predicated region fallthrough
CT: control target
= control target key end

     0   :  { %7 = vsyncpa [#allocation3], 0  ;;  %s245_s0 = inlined_call_operand.hbm [shape: f32[16,32], index: 0, kind: input, shape index: {}]   ;;  %s246_s1 = inlined_call_operand.hbm [shape: f32[1,32], index: 1, kind: input, shape index: {}]   ;;  %s247_s2 = inlined_call_operand.hbm [shape: f32[16,32], index: 2, kind: output, shape index: {}]  }
   0x1   :  { %8 = vsyncpa [#allocation6], 0 }
   0x2   :  { %9 = vsyncpa [#allocation4], 0  ;;  %s14_s11 = sshll.u32 %s245_s0, 4  ;;  %s205_s12 = smov [#allocation2]   ;;  %s15_s11 = int_to_ptr.hbm [resolvable:$true] %s14_s11 }
   0x3   :  { %s16_s13 = sshll.u32 %s205_s12, 4  ;;  %s28_s16 = sshll.u32 %s246_s1, 4  ;;  %s17_s13 = int_to_ptr.vmem [resolvable:$true] %s16_s13  ;;  %s29_s16 = int_to_ptr.hbm [resolvable:$true] %s28_s16 }
   0x4   :  { %s206_s17 = smov 128   ;;  %s207_s18 = smov 8  }
   0x5   :  { %22 = dma.hbm_to_vmem [thread:$0]  %s15_s11, 256, %s17_s13, [#allocation3], %s206_s17, %s206_s17, %s207_s18  }
   0x6   :  { %s208_s19 = smov [#allocation5]  }
   0x7   :  { %s30_s20 = sshll.u32 %s208_s19, 4  ;;  %s31_s20 = int_to_ptr.vmem [resolvable:$true] %s30_s20 }
   0x8   :  { %33 = dma.hbm_to_vmem [thread:$0]  %s29_s16, 16, %s31_s20, [#allocation6]  }
   0x9   :  { %199 = dma.done.wait [#allocation3], 256  }
   0xa   :  { %200 = vsyncadd [#allocation3], 4294967040 }
   0xb   :  { %201 = dma.done.wait [#allocation6], 16  }
   0xc   :  { %202 = vsyncadd [#allocation6], 4294967280  ;;  %v42_v0 = vld [vmem:[#allocation2] sm:$0xff]  ;;  %vm47_vm0 = vcmask 261120   ;;  %v43_v2 = vld [vmem:[#allocation2 + $0x8] sm:$0xff]  ;;  %v209_v6 = vmov 32.0  }
   0xd   :  { %v45_v1 = vmul.f32 %v42_v0, %v42_v0  ;;  %v46_v4 = vmul.f32 %v43_v2, %v43_v2  ;;  %121 = vrcp.f32 %v209_v6  ;;  %v120_v27 = vld [vmem:[#allocation5] ss:$0 sm:$0xff]  ;;  %s210_s0 = smov [#allocation7]   ;;  %s100_s23 = sshll.u32 %s247_s2, 4  ;;  %s101_s23 = int_to_ptr.hbm [resolvable:$true] %s100_s23 }
   0xe   :  { %s98_s1 = sshll.u32 %s210_s0, 4  ;;  %s99_s1 = int_to_ptr.vmem [resolvable:$true] %s98_s1 }
   0xf   :  { %v48_v3 = vsel %vm47_vm0, %v45_v1, 0.0  ;;  %v51_v5 = vsel %vm47_vm0, %v46_v4, 0.0 }
  0x10   :  { %49 = vadd.xlane.f32.xlu0 %v48_v3 }
  0x13   :  { %v122_v7 = vpop.eup %121 }
  0x14   :  { %v55_v8 = vmul.f32 32.0, %v122_v7  ;;  %vm59_vm1 = vweird.f32 %v122_v7 }
  0x16   :  { %v56_v9 = vsub.f32 1.0, %v55_v8 }
  0x18   :  { %52 = vadd.xlane.f32.xlu0 %v51_v5  ;;  %v57_v10 = vmul.f32 %v122_v7, %v56_v9 }
  0x1a   :  { %v58_v11 = vadd.f32 %v122_v7, %v57_v10 }
  0x1c   :  { %v60_v12 = vsel %vm59_vm1, %v122_v7, %v58_v11 }
  0x83   :  { %v50_v13 = vpop.xlane.xlu0 %49 }
  0x84   :  { %v61_v14 = vmul.f32 %v60_v12, %v50_v13 }
  0x86   :  { %v63_v15 = vadd.f32 1e-05, %v61_v14 }
  0x88   :  { %123 = vrsqrt.f32 %v63_v15  ;;  %vm71_vm3 = vweird.f32 %v63_v15 }
  0x8b   :  { %v53_v16 = vpop.xlane.xlu0 %52 }
  0x8c   :  { %v62_v17 = vmul.f32 %v60_v12, %v53_v16 }
  0x8e   :  { %v124_v18 = vpop.eup %123  ;;  %v64_v19 = vadd.f32 1e-05, %v62_v17 }
  0x8f   :  { %v66_v20 = vmul.f32 %v124_v18, %v63_v15  ;;  %vm72_vm2 = vweird.f32 %v124_v18 }
  0x90   :  { %125 = vrsqrt.f32 %v64_v19  ;;  %vm73_vm4 = vmor %vm71_vm3, %vm72_vm2  ;;  %vm81_vm6 = vweird.f32 %v64_v19 }
  0x91   :  { %v67_v21 = vmul.f32 %v124_v18, %v66_v20 }
  0x93   :  { %v68_v22 = vmul.f32 0.5, %v67_v21 }
  0x95   :  { %v69_v23 = vsub.f32 1.5, %v68_v22 }
  0x96   :  { %v126_v24 = vpop.eup %125 }
  0x97   :  { %v70_v25 = vmul.f32 %v124_v18, %v69_v23  ;;  %v76_v26 = vmul.f32 %v126_v24, %v64_v19  ;;  %vm82_vm5 = vweird.f32 %v126_v24 }
  0x98   :  { %vm83_vm7 = vmor %vm81_vm6, %vm82_vm5 }
  0x99   :  { %v74_v28 = vsel %vm73_vm4, %v124_v18, %v70_v25  ;;  %v77_v29 = vmul.f32 %v126_v24, %v76_v26 }
  0x9a   :  { %v85_v30 = vmul.f32 %v74_v28, %v42_v0 }
  0x9b   :  { %v78_v31 = vmul.f32 0.5, %v77_v29 }
  0x9c   :  { %v90_v32 = vmul.f32 %v120_v27, %v85_v30 }
  0x9d   :  { %v79_v33 = vsub.f32 1.5, %v78_v31 }
  0x9e   :  { %92 = vst.msk [vmem:[#allocation7] sm:$0xff] %vm47_vm0, %v90_v32 }
  0x9f   :  { %v80_v34 = vmul.f32 %v126_v24, %v79_v33 }
  0xa1   :  { %v84_v35 = vsel %vm83_vm7, %v126_v24, %v80_v34 }
  0xa2   :  { %v86_v36 = vmul.f32 %v84_v35, %v43_v2 }
  0xa4   :  { %v91_v37 = vmul.f32 %v120_v27, %v86_v36 }
  0xa6   :  { %93 = vst.msk [vmem:[#allocation7 + $0x8] sm:$0xff] %vm47_vm0, %v91_v37 }
  0xa7   :  { %106 = dma.vmem_to_hbm [thread:$0]  %s99_s1, 256, %s101_s23, [#allocation4], %s206_s17, %s206_s17, %s207_s18  }
  0xa8   :  { %203 = dma.done.wait [#allocation4], 256  }
  0xa9   :  { %204 = vsyncadd [#allocation4], 4294967040 }
  0xaa   :  { %111 = vsyncpa [#allocation3], 1 }
  0xab   :  { %112 = vsyncpa [#allocation6], 1 }
  0xac   :  { %113 = vsyncpa [#allocation4], 1 }

</bundles_post_ra>
